<compile_context>
chip_gen: v5e
topology: v5e:2x2
jax: 0.10.0
libtpu: 0.0.40
codegen_flags: <defaults>
</compile_context>

<pallas_src>
import numpy as np

import jax
import jax.numpy as jnp
from jax.experimental import pallas as pl
from jax.experimental.pallas import tpu as pltpu


# ----------------------------------------------------------------------------
# Pallas kernel: block-Toeplitz 3x3 conv, lane-dense NHWC slabs, one image/step.
# ----------------------------------------------------------------------------
def _make_kernel(Hout, WCin, WoutCout, stride):
    span = (Hout - 1) * stride + 1

    def kernel(x_ref, w_ref, o_ref):
        # x_ref : (1, H+2, W*Cin)          bf16  (lane-dense padded-H image)
        # w_ref : (3, W*Cin, Wout*Cout)    bf16  (resident Toeplitz weight)
        # o_ref : (1, Hout, Wout*Cout)     bf16  (lane-dense output slab)
        x = x_ref[0]                                    # (H+2, W*Cin)
        # TODO(synk): for stride > 1, do the row decimation in the DMA
        # (strided pl.ds on the HBM source) instead of a VMEM strided slice.
        acc = jnp.dot(x[0:span:stride, :], w_ref[0],
                      preferred_element_type=jnp.float32)
        for kh in range(1, 3):
            acc = acc + jnp.dot(x[kh:kh + span:stride, :], w_ref[kh],
                                preferred_element_type=jnp.float32)
        o_ref[0] = acc.astype(o_ref.dtype)

    return kernel


def _vmem_limit_bytes():
    """Scoped-VMEM limit derived from the device (v7x: 64 MiB/TC)."""
    try:
        cap = pltpu.get_tpu_info().vmem_capacity_bytes
        return int(min(3 * cap // 4, 96 * 1024 * 1024))
    except Exception:
        return 32 * 1024 * 1024


def hetconv_pallas(x_nchw, toeplitz_w, stride):
    """x_nchw: (N, Cin, H, W); toeplitz_w: (3, W*Cin, Wout*Cout) bf16."""
    N, Cin, H, W = x_nchw.shape
    KH, WCin, WoutCout = toeplitz_w.shape
    assert KH == 3 and WCin == W * Cin
    Hout = (H - 1) // stride + 1
    Wout = (W - 1) // stride + 1
    Cout = WoutCout // Wout
    Hp = H + 2
    # Lane-dense output guard: Wout*Cout should be a multiple of 128 for
    # unmasked vst's (true for the test config: 16*8 = 128).

    # NCHW -> NHWC -> lane-dense (N, H, W*Cin) bf16, pad H only (the W pad is
    # folded into the Toeplitz weight, so the lane width stays W*Cin).
    # TODO(synk): fold this transpose/pad and the final NCHW transpose into the
    # kernel / surrounding model (keep NHWC end-to-end) to remove the extra
    # HBM passes around this memory-bound op.
    x_lane = jnp.transpose(x_nchw, (0, 2, 3, 1)).astype(jnp.bfloat16)
    x_lane = x_lane.reshape(N, H, WCin)
    x_padh = jnp.pad(x_lane, ((0, 0), (1, 1), (0, 0)))      # (N, H+2, W*Cin)

    kernel = _make_kernel(Hout, WCin, WoutCout, stride)

    flops = 2 * N * 3 * Hout * WCin * WoutCout
    bytes_accessed = int(N * Hp * WCin * 2 + 3 * WCin * WoutCout * 2
                         + N * Hout * WoutCout * 2)

    out = pl.pallas_call(
        kernel,
        out_shape=jax.ShapeDtypeStruct((N, Hout, WoutCout), jnp.bfloat16),
        grid=(N,),
        in_specs=[
            pl.BlockSpec((1, Hp, WCin), lambda n: (n, 0, 0)),       # image n
            pl.BlockSpec((3, WCin, WoutCout), lambda n: (0, 0, 0)),  # resident W
        ],
        out_specs=pl.BlockSpec((1, Hout, WoutCout), lambda n: (n, 0, 0)),
        compiler_params=pltpu.CompilerParams(
            dimension_semantics=("parallel",),
            vmem_limit_bytes=_vmem_limit_bytes(),
        ),
        cost_estimate=pl.CostEstimate(flops=flops, transcendentals=0,
                                      bytes_accessed=bytes_accessed),
    )(x_padh, toeplitz_w)

    out = out.reshape(N, Hout, Wout, Cout)
    return jnp.transpose(out, (0, 3, 1, 2)).astype(x_nchw.dtype)


# ----------------------------------------------------------------------------
# Host-side weight assembly (one-off, numpy).
# ----------------------------------------------------------------------------
def build_hetconv_weights(key, Cin, Cout, P):
    """Deterministic branch weights mirroring the PyTorch __init__ shapes."""
    Cin_g, Cout_g = Cin // P, Cout // P
    keys = jax.random.split(key, 2 * P)
    w3_branches, w1_branches = [], []
    for i in range(P):
        w3 = jax.random.normal(keys[2 * i], (Cout_g, Cin_g, 3, 3),
                               jnp.float32) * 0.1
        w1 = jax.random.normal(keys[2 * i + 1], (Cout_g, Cin - Cin_g, 1, 1),
                               jnp.float32) * 0.1
        w3_branches.append(w3)
        w1_branches.append(w1)
    return w3_branches, w1_branches


def idx_1x1(i, Cin, P):
    # same as HetConv.compute_convolution_1x1_index
    idx = [j for j in range(Cin)]
    k = i
    while k < Cin:
        idx.remove(k)
        k += P
    return idx


def combine_weights_oihw(w3_branches, w1_branches, Cin, Cout, P):
    """Assemble one dense OIHW 3x3 weight equivalent to the full HetConv,
    folding the 1x1 taps into the centre tap and applying the final
    channel-interleave permute of HetConv.forward."""
    W = np.zeros((Cout, Cin, 3, 3), np.float32)
    Cout_g = Cout // P
    for i in range(P):
        idx3 = list(range(i, Cin, P))
        idx1 = idx_1x1(i, Cin, P)
        w3 = np.asarray(w3_branches[i])
        w1 = np.asarray(w1_branches[i])
        for j in range(Cout_g):
            o = j * P + i  # output channel after the final permute
            W[o, idx3, :, :] = w3[j]
            W[o, idx1, 1, 1] += w1[j, :, 0, 0]
    return W


def build_toeplitz_weight(w_oihw, W, stride):
    """Structured weight T: (3, W*Cin, Wout*Cout).
    out[h, w_out*Cout+co] = sum_kh  x_padH[h*stride+kh, :] @ T[kh][:, w_out*Cout+co]
    W-direction zero padding is implicit (pad columns get no entries)."""
    Cout, Cin, KH, KW = w_oihw.shape
    Wout = (W - 1) // stride + 1
    T = np.zeros((KH, W * Cin, Wout * Cout), np.float32)
    for kh in range(KH):
        for w_out in range(Wout):
            for kw in range(KW):
                w_in = w_out * stride + kw - 1        # unpadded input column
                if 0 <= w_in < W:
                    T[kh,
                      w_in * Cin:(w_in + 1) * Cin,
                      w_out * Cout:(w_out + 1) * Cout] = w_oihw[:, :, kh, kw].T
    return T


# ----------------------------------------------------------------------------
# Pure-JAX references.
# ----------------------------------------------------------------------------
def hetconv_reference(x, w3_branches, w1_branches, P, stride):
    """Branch-wise f32 reference mirroring the PyTorch forward literally."""
    N, Cin, H, W = x.shape
    dn = jax.lax.conv_dimension_numbers(x.shape, w3_branches[0].shape,
                                        ('NCHW', 'OIHW', 'NCHW'))
    outs = []
    for i in range(P):
        x3 = x[:, i::P, :, :]
        o3 = jax.lax.conv_general_dilated(x3, w3_branches[i],
                                          (stride, stride), ((1, 1), (1, 1)),
                                          dimension_numbers=dn,
                                          precision=jax.lax.Precision.HIGHEST)
        idx1 = jnp.array(idx_1x1(i, Cin, P))
        x1 = x[:, idx1, :, :]
        o1 = jax.lax.conv_general_dilated(x1, w1_branches[i],
                                          (stride, stride), ((0, 0), (0, 0)),
                                          dimension_numbers=dn,
                                          precision=jax.lax.Precision.HIGHEST)
        outs.append(o3 + o1)
    Cg = outs[0].shape[1]
    C = P * Cg
    cat = jnp.concatenate(outs, axis=1)
    Ho, Wo = cat.shape[2], cat.shape[3]
    return (cat.reshape(N, P, Cg, Ho, Wo)
               .transpose(0, 2, 1, 3, 4)
               .reshape(N, C, Ho, Wo))


def dense_conv_reference(x_nchw, w_oihw, stride, compute_dtype):
    """Dense 3x3 conv with the combined OIHW weight (XLA), f32 accumulation."""
    x_nhwc = jnp.transpose(x_nchw, (0, 2, 3, 1)).astype(compute_dtype)
    w = jnp.asarray(w_oihw).astype(compute_dtype)
    dn = jax.lax.conv_dimension_numbers(x_nhwc.shape, w.shape,
                                        ('NHWC', 'OIHW', 'NHWC'))
    prec = (jax.lax.Precision.HIGHEST
            if compute_dtype == jnp.float32 else None)
    out = jax.lax.conv_general_dilated(
        x_nhwc, w, (stride, stride), ((1, 1), (1, 1)),
        dimension_numbers=dn, precision=prec,
        preferred_element_type=jnp.float32)
    return jnp.transpose(out, (0, 3, 1, 2))


if __name__ == "__main__":
    N, Cin, Cout, H, W = 2, 4, 8, 16, 16
    P, stride = 2, 1

    key = jax.random.PRNGKey(0)
    kx, kw = jax.random.split(key)
    x = jax.random.normal(kx, (N, Cin, H, W), jnp.float32)

    w3_b, w1_b = build_hetconv_weights(kw, Cin, Cout, P)
    w_oihw = combine_weights_oihw(w3_b, w1_b, Cin, Cout, P)
    t_w = jnp.asarray(build_toeplitz_weight(w_oihw, W, stride), jnp.bfloat16)

    run = jax.jit(lambda xi: hetconv_pallas(xi, t_w, stride))
    out = jax.block_until_ready(run(x))
    assert out.shape == (N, Cout, H, W)

    # 1) Weight-folding check (f32 XLA): dense conv with combined weight
    #    must equal the literal branch-wise HetConv forward.
    ref_branch = hetconv_reference(x, w3_b, w1_b, P, stride)
    dense_f32 = dense_conv_reference(x, w_oihw, stride, jnp.float32)
    assert np.allclose(np.asarray(dense_f32), np.asarray(ref_branch),
                       atol=1e-4, rtol=1e-4)

    # 2) Kernel check (tight): Pallas (bf16 operands, f32 acc, bf16 store) vs
    #    XLA dense conv on the same bf16 operands, rounded to bf16.
    dense_bf16 = dense_conv_reference(x, w_oihw, stride, jnp.bfloat16)
    dense_bf16 = dense_bf16.astype(jnp.bfloat16).astype(jnp.float32)
    assert np.allclose(np.asarray(out), np.asarray(dense_bf16),
                       atol=1.5e-2, rtol=1.5e-2)

    # 3) End-to-end sanity vs the exact f32 HetConv reference (looser tolerance
    #    accounts for bf16 rounding of inputs/weights/output).
    assert np.allclose(np.asarray(out), np.asarray(ref_branch),
                       atol=4e-2, rtol=4e-2)

    print("KERNEL_OK")
</pallas_src>

<mosaic_0001>
module attributes {stable_mosaic.version = 11 : i64} {
  func.func @kernel(%arg0: i32, %arg1: memref<1x18x64xbf16, #tpu.memory_space<vmem>>, %arg2: memref<3x64x128xbf16, #tpu.memory_space<vmem>>, %arg3: memref<1x16x128xbf16, #tpu.memory_space<vmem>>) attributes {dimension_semantics = [#tpu.dimension_semantics<parallel>], iteration_bounds = array<i64: 2>, scalar_prefetch = 0 : i64, scratch_operands = 0 : i64, tpu.core_type = #tpu.core_type<tc>, window_params = [{transform_indices = @transform_0, window_bounds = array<i64: 1, 18, 64>}, {pipeline_mode = #tpu.pipeline_mode<synchronous>, transform_indices = @transform_1, window_bounds = array<i64: 3, 64, 128>}, {transform_indices = @transform_2, window_bounds = array<i64: 1, 16, 128>}]} {
    %c0 = arith.constant 0 : index
    %c0_0 = arith.constant 0 : index
    %c0_1 = arith.constant 0 : index
    %0 = vector.load %arg1[%c0, %c0_0, %c0_1] : memref<1x18x64xbf16, #tpu.memory_space<vmem>>, vector<1x18x64xbf16>
    %1 = vector.shape_cast %0 : vector<1x18x64xbf16> to vector<18x64xbf16>
    %2 = vector.extract_strided_slice %1 {offsets = [0, 0], sizes = [16, 64], strides = [1, 1]} : vector<18x64xbf16> to vector<16x64xbf16>
    %c0_2 = arith.constant 0 : index
    %c0_3 = arith.constant 0 : index
    %c0_4 = arith.constant 0 : index
    %3 = vector.load %arg2[%c0_2, %c0_3, %c0_4] : memref<3x64x128xbf16, #tpu.memory_space<vmem>>, vector<1x64x128xbf16>
    %4 = vector.shape_cast %3 : vector<1x64x128xbf16> to vector<64x128xbf16>
    %cst = arith.constant dense<0.000000e+00> : vector<16x128xf32>
    %5 = tpu.matmul %2, %4, %cst {dimension_numbers = #tpu.dot_dimension_numbers<[1], [0], [0], [1], [0, 0, 1, 1], [], []>} : vector<16x64xbf16>, vector<64x128xbf16>, vector<16x128xf32> -> vector<16x128xf32>
    %6 = vector.extract_strided_slice %1 {offsets = [1, 0], sizes = [16, 64], strides = [1, 1]} : vector<18x64xbf16> to vector<16x64xbf16>
    %c1 = arith.constant 1 : index
    %c0_5 = arith.constant 0 : index
    %c0_6 = arith.constant 0 : index
    %7 = vector.load %arg2[%c1, %c0_5, %c0_6] : memref<3x64x128xbf16, #tpu.memory_space<vmem>>, vector<1x64x128xbf16>
    %8 = vector.shape_cast %7 : vector<1x64x128xbf16> to vector<64x128xbf16>
    %cst_7 = arith.constant dense<0.000000e+00> : vector<16x128xf32>
    %9 = tpu.matmul %6, %8, %cst_7 {dimension_numbers = #tpu.dot_dimension_numbers<[1], [0], [0], [1], [0, 0, 1, 1], [], []>} : vector<16x64xbf16>, vector<64x128xbf16>, vector<16x128xf32> -> vector<16x128xf32>
    %10 = arith.addf %5, %9 : vector<16x128xf32>
    %11 = vector.extract_strided_slice %1 {offsets = [2, 0], sizes = [16, 64], strides = [1, 1]} : vector<18x64xbf16> to vector<16x64xbf16>
    %c2 = arith.constant 2 : index
    %c0_8 = arith.constant 0 : index
    %c0_9 = arith.constant 0 : index
    %12 = vector.load %arg2[%c2, %c0_8, %c0_9] : memref<3x64x128xbf16, #tpu.memory_space<vmem>>, vector<1x64x128xbf16>
    %13 = vector.shape_cast %12 : vector<1x64x128xbf16> to vector<64x128xbf16>
    %cst_10 = arith.constant dense<0.000000e+00> : vector<16x128xf32>
    %14 = tpu.matmul %11, %13, %cst_10 {dimension_numbers = #tpu.dot_dimension_numbers<[1], [0], [0], [1], [0, 0, 1, 1], [], []>} : vector<16x64xbf16>, vector<64x128xbf16>, vector<16x128xf32> -> vector<16x128xf32>
    %15 = arith.addf %10, %14 : vector<16x128xf32>
    %16 = arith.truncf %15 : vector<16x128xf32> to vector<16x128xbf16>
    %c0_11 = arith.constant 0 : index
    %c0_12 = arith.constant 0 : index
    %c0_13 = arith.constant 0 : index
    %17 = vector.load %arg3[%c0_11, %c0_12, %c0_13] : memref<1x16x128xbf16, #tpu.memory_space<vmem>>, vector<1x16x128xbf16>
    %18 = vector.shape_cast %17 : vector<1x16x128xbf16> to vector<16x128xbf16>
    %19 = vector.shape_cast %16 : vector<16x128xbf16> to vector<1x16x128xbf16>
    tpu.vector_store %arg3[%c0_11, %c0_12, %c0_13], %19 {strides = array<i32>} : memref<1x16x128xbf16, #tpu.memory_space<vmem>>, vector<1x16x128xbf16>,
    return
  }
  func.func @transform_0(%arg0: i32) -> (i32, i32, i32) {
    %c0_i32 = arith.constant 0 : i32
    %c0_i32_0 = arith.constant 0 : i32
    %c0_i32_1 = arith.constant 0 : i32
    return %arg0, %c0_i32, %c0_i32_0 : i32, i32, i32
  }
  func.func @transform_1(%arg0: i32) -> (i32, i32, i32) {
    %c0_i32 = arith.constant 0 : i32
    %c0_i32_0 = arith.constant 0 : i32
    %c0_i32_1 = arith.constant 0 : i32
    %c0_i32_2 = arith.constant 0 : i32
    return %c0_i32, %c0_i32_0, %c0_i32_1 : i32, i32, i32
  }
  func.func @transform_2(%arg0: i32) -> (i32, i32, i32) {
    %c0_i32 = arith.constant 0 : i32
    %c0_i32_0 = arith.constant 0 : i32
    %c0_i32_1 = arith.constant 0 : i32
    return %arg0, %c0_i32, %c0_i32_0 : i32, i32, i32
  }
}

</mosaic_0001>

<bundles_post_ra>
// kernel: _lambda_.1
= control target key start
LH: loop header
LB: loop body
LE: loop exit
PB: predicated region body
PF: predicated region fallthrough
CT: control target
= control target key end

     0   :  { %s515_s9 = smov 0   ;;  %s572_s0 = inlined_call_operand.vmem [shape: bf16[2,18,64], index: 0, kind: input, shape index: {}]   ;;  %s573_s1 = inlined_call_operand.vmem [shape: bf16[3,64,128], index: 1, kind: input, shape index: {}]   ;;  %s574_s2 = inlined_call_operand.vmem [shape: bf16[2,16,128], index: 2, kind: output, shape index: {}]  }
   0x1 LB: > { %s383_s10 = sadd.s32 4294967295, %s498_s9   ;;  %p387_p0 = scmp.ge.s32.totalorder %s498_s9, 1  ;;  %s498_s9 = sphi %s515_s9, %s12_s9  }
   0x2   : > { %p112_p1 = scmp.lt.s32.totalorder %s498_s9, 3 }
   0x4   : > { %p113_p2 = pnand %p387_p0, %p112_p1 }
   0x5   : > { %p134_p3 = scmp.lt.s32.totalorder (!%p113_p2), %s383_s10, 1 }
   0x6   : > { %116 = sbr.rel (%p113_p2) target bundleno = 174 (0xae), region = 28 }
   0xb   : > { %v473_v0 = vld [vmem:[%s573_s1 + $0x38] sm:$0xff]  ;;  %v472_v3 = vld [vmem:[%s573_s1 + $0x30] sm:$0xff]  ;;  %s576_s10 = smov (!%p134_p3, %s383_s10), 1  ;;  %v471_v6 = vld [vmem:[%s573_s1 + $0x28] sm:$0xff]  ;;  %vm277_vm0 = vcmask 1046528   ;;  %vm210_vm2 = vcmask 523264  }
   0xc   : > { %v469_v1 = vld [vmem:[%s573_s1 + $0x18] sm:$0xff]  ;;  %218 = vmatpush.bf16.msra.mxu0 %v473_v0  ;;  %v468_v4 = vld [vmem:[%s573_s1 + $0x10] sm:$0xff]  ;;  %s483_s23 = smul.u32 12, %s576_s10  ;;  %v467_v7 = vld [vmem:[%s573_s1 + $0x8] sm:$0xff]  ;;  %vm173_vm1 = vsmask.f32 7424 }
   0xd   : > { %v477_v2 = vld [vmem:[%s573_s1 + $0x58] sm:$0xff]  ;;  %258 = vmatpush.bf16.msra.mxu1 %v469_v1  ;;  %v476_v5 = vld [vmem:[%s573_s1 + $0x50] sm:$0xff]  ;;  %v475_v8 = vld [vmem:[%s573_s1 + $0x48] sm:$0xff]  ;;  %s464_s13 = sshll.u32 %s576_s10, 3 }
   0xe   : > { %312 = vmatpush.bf16.msra.mxu2 %v477_v2  ;;  %s138_s30 = scalar_lea.vmem %s572_s0, %s483_s23  ;;  %v470_v14 = vld [vmem:[%s573_s1 + $0x20] sm:$0xff]  ;;  %s143_s16 = scalar_lea.vmem %s574_s2, %s464_s13 }
   0xf   : > { %v465_v9 = vld [vmem:[%s138_s30] sm:$0xff]  ;;  %v147_v10 = vld [vmem:[%s138_s30 + $0x8] sm:$0x1] }
  0x10   : > { %219 = vmatpush.bf16.msra.mxu0 %v472_v3  ;;  %v170_v11 = vunpack.c.l.b16 %v147_v10  ;;  %v175_v12 = vshrl.u32 %v465_v9, 16  ;;  %v177_v13 = vshll.u32 %v465_v9, 16  ;;  %v466_v15 = vld [vmem:[%s573_s1] sm:$0xff]  ;;  %v278_v19 = vrot.slane %v465_v9, 1 }
  0x11   : > { %259 = vmatpush.bf16.msra.mxu1 %v468_v4  ;;  %v474_v17 = vld [vmem:[%s573_s1 + $0x40] sm:$0xff] }
  0x12   : > { %313 = vmatpush.bf16.msra.mxu2 %v476_v5  ;;  %v172_v16 = vpack.c.b16 %v170_v11, %v170_v11  ;;  %v179_v18 = vrot.slane %v177_v13, 1 }
  0x14   : > { %220 = vmatpush.bf16.msra.mxu0 %v471_v6  ;;  %v182_v20 = vshll.u32 %v172_v16, 16  ;;  %v279_v21 = vrot.slane %v172_v16, 1  ;;  %v180_v22 = vor.u32 %v179_v18, %v175_v12 }
  0x15   : > { %260 = vmatpush.bf16.msra.mxu1 %v467_v7 }
  0x16   : > { %314 = vmatpush.bf16.msra.mxu2 %v475_v8  ;;  %v184_v23 = vrot.slane %v182_v20, 1  ;;  %v280_v24 = vsel %vm277_vm0, %v278_v19, %v279_v21 }
  0x18   : > { %221 = vmatpush.bf16.msra.mxu0 %v470_v14  ;;  %v185_v25 = vsel %vm173_vm1, %v180_v22, %v184_v23 }
  0x19   : > { %261 = vmatpush.bf16.msra.mxu1 %v466_v15 }
  0x1a   : > { %315 = vmatpush.bf16.msra.mxu2 %v474_v17 }
  0x1b   : > { %419 = vmatmul.msk.bf16.vlgmr.msra.gmra.mxu0 %vm210_vm2, %v185_v25 }
  0x1c   : > { %436 = vmatmul.msk.bf16.vlgmr.msra.gmra.mxu1 %vm210_vm2, %v465_v9 }
  0x1d   : > { %461 = vmatmul.msk.bf16.vlgmr.msra.gmra.mxu2 %vm210_vm2, %v280_v24 }
  0x98   : > { %v223_v26 = vpop.f32.mrf.mxu0 }
  0x99   : > { %v263_v27 = vpop.f32.mrf.mxu1 }
  0x9a   : > { %v264_v31 = vadd.f32 %v263_v27, %v223_v26 }
  0xa0   : > { %v317_v28 = vpop.f32.mrf.mxu2  ;;  %v225_v29 = vpop.f32.mrf.mxu0 }
  0xa1   : > { %v265_v30 = vpop.f32.mrf.mxu1  ;;  %v322_v34 = vadd.f32 %v317_v28, %v264_v31 }
  0xa2   : > { %v266_v32 = vadd.f32 %v265_v30, %v225_v29 }
  0xa8   : > { %v319_v33 = vpop.f32.mrf.mxu2 }
  0xa9   : > { %v323_v35 = vadd.f32 %v319_v33, %v266_v32 }
  0xab   : > { %v481_v36 = vpack.c.bf16 %v323_v35, %v322_v34 }
  0xad   : > { %482 = vst [vmem:[%s143_s16] sm:$0xff] %v481_v36  }
  0xae PF: > { %s12_s9 = sadd.s32 1, %s498_s9  }
  0xaf   : > { %p9_p4 = scmp.ge.s32.totalorder %s12_s9, 4  }
  0xb1   :  { %11 = sbr.rel (!%p9_p4) target bundleno = 1 (0x1), region = 60 }

</bundles_post_ra>
